<compile_context>
chip_gen: v6e
topology: v6e:2x2x1
jax: 0.10.0
libtpu: 0.0.40
codegen_flags: <defaults>
</compile_context>

<pallas_src>
import functools

import jax
import jax.numpy as jnp
from jax.experimental import pallas as pl
from jax.experimental.pallas import tpu as pltpu


def _round_up(n: int, m: int) -> int:
    return ((n + m - 1) // m) * m


def _qnet_kernel(x_ref, w1_ref, b1_ref, w2_ref, b2_ref, w3_ref, b3_ref, o_ref):
    # All activations are (features, TB): batch sits on the lane axis -> dense vregs,
    # unmasked full-width stores for the output tile.
    x = x_ref[...]                                                     # (state_dim, TB) bf16
    h1 = jnp.dot(w1_ref[...], x, preferred_element_type=jnp.float32)   # bf16 MXU, f32 acc
    h1 = jnp.maximum(h1 + b1_ref[...], 0.0)                            # f32 elementwise
    h2 = jnp.dot(w2_ref[...], h1, preferred_element_type=jnp.float32)  # (16, TB) f32
    h2 = jnp.maximum(h2 + b2_ref[...], 0.0)
    o_ref[...] = (
        jnp.dot(w3_ref[...], h2, preferred_element_type=jnp.float32) + b3_ref[...]
    ).astype(o_ref.dtype)                                              # (action_num, TB)


@functools.partial(jax.jit, static_argnames=("tb_target",))
def qnet_forward(x, params, *, tb_target: int = 512):
    """x: (B, state_dim) f32; params: torch-layout weights (out,in) and biases (out,1).

    Returns (B, action_num) f32, matching torch SomeQNet.forward.
    """
    w1, b1, w2, b2, w3, b3 = (
        params["w1"], params["b1"], params["w2"],
        params["b2"], params["w3"], params["b3"],
    )
    B, state_dim = x.shape
    h1_dim = w1.shape[0]
    h2_dim = w2.shape[0]
    action_num = w3.shape[0]

    # Lane-dense layout: batch on the last (lane) axis, padded to the batch tile.
    # TODO(synk): in a real RL pipeline keep activations (features, B) end-to-end to
    # avoid the boundary transposes; they are kept here only to preserve the torch API.
    tb = min(tb_target, _round_up(B, 128))
    b_pad = _round_up(B, tb)
    x_t = x.T                                    # (state_dim, B)
    if b_pad != B:
        x_t = jnp.pad(x_t, ((0, 0), (0, b_pad - B)))
    x_t = x_t.astype(jnp.bfloat16)               # halve HBM traffic of the dominant stream
    w1_b = w1.astype(jnp.bfloat16)               # matching operand for a clean bf16 MXU dot

    grid = (b_pad // tb,)
    flops = 2 * b_pad * (state_dim * h1_dim + h1_dim * h2_dim + h2_dim * action_num)
    bytes_accessed = (
        state_dim * b_pad * 2                    # x (bf16) read
        + action_num * b_pad * 4                 # out (f32) write
        + h1_dim * state_dim * 2                 # w1 (bf16)
        + (h2_dim * h1_dim + action_num * h2_dim + h1_dim + h2_dim + action_num) * 4
    )

    out_t = pl.pallas_call(
        _qnet_kernel,
        out_shape=jax.ShapeDtypeStruct((action_num, b_pad), jnp.float32),
        grid=grid,
        in_specs=[
            # batch-tiled input: block i covers columns [i*tb, (i+1)*tb)
            pl.BlockSpec((state_dim, tb), lambda i: (0, i)),
            # weights / biases: block-invariant -> DMA'd once, resident across the grid
            pl.BlockSpec((h1_dim, state_dim), lambda i: (0, 0)),
            pl.BlockSpec((h1_dim, 1), lambda i: (0, 0)),
            pl.BlockSpec((h2_dim, h1_dim), lambda i: (0, 0)),
            pl.BlockSpec((h2_dim, 1), lambda i: (0, 0)),
            pl.BlockSpec((action_num, h2_dim), lambda i: (0, 0)),
            pl.BlockSpec((action_num, 1), lambda i: (0, 0)),
        ],
        out_specs=pl.BlockSpec((action_num, tb), lambda i: (0, i)),
        compiler_params=pltpu.CompilerParams(
            dimension_semantics=("parallel",),   # shard batch tiles across v7x's 2 TCs
        ),
        cost_estimate=pl.CostEstimate(
            flops=flops, transcendentals=0, bytes_accessed=bytes_accessed
        ),
    )(x_t, w1_b, b1, w2, b2, w3, b3)

    return out_t[:, :B].T                        # back to (B, action_num)


def init_params(key, state_dim, action_num):
    """torch.nn.Linear-style init: W (out,in), b (out,1), uniform(+-1/sqrt(fan_in))."""
    def linear_init(key, fan_in, fan_out):
        kw, kb = jax.random.split(key)
        bound = 1.0 / jnp.sqrt(jnp.float32(fan_in))
        w = jax.random.uniform(kw, (fan_out, fan_in), jnp.float32, -bound, bound)
        b = jax.random.uniform(kb, (fan_out, 1), jnp.float32, -bound, bound)
        return w, b

    k1, k2, k3 = jax.random.split(key, 3)
    w1, b1 = linear_init(k1, state_dim, 16)
    w2, b2 = linear_init(k2, 16, 16)
    w3, b3 = linear_init(k3, 16, action_num)
    return {"w1": w1, "b1": b1, "w2": w2, "b2": b2, "w3": w3, "b3": b3}


def qnet_ref(x, p):
    """Pure-JAX reference mirroring the kernel's numerics (bf16 x/w1, f32 elsewhere)."""
    xb = x.astype(jnp.bfloat16)
    w1b = p["w1"].astype(jnp.bfloat16)
    h1 = jnp.maximum(
        jnp.dot(xb, w1b.T, preferred_element_type=jnp.float32) + p["b1"][:, 0], 0.0)
    h2 = jnp.maximum(
        jnp.dot(h1, p["w2"].T, preferred_element_type=jnp.float32) + p["b2"][:, 0], 0.0)
    return jnp.dot(h2, p["w3"].T, preferred_element_type=jnp.float32) + p["b3"][:, 0]


if __name__ == "__main__":
    state_dim = 4
    action_num = 2

    key = jax.random.PRNGKey(0)
    kx, kp, kx2 = jax.random.split(key, 3)
    params = init_params(kp, state_dim, action_num)

    # Small batch (single grid step, padded to one 128-wide lane tile).
    batch = 8
    x = jax.random.normal(kx, (batch, state_dim), jnp.float32)
    out = jax.block_until_ready(qnet_forward(x, params))
    ref = qnet_ref(x, params)
    assert out.shape == (batch, action_num)
    assert jnp.allclose(out, ref, atol=1e-4, rtol=1e-4), "mismatch vs JAX reference (B=8)"

    # Larger, non-tile-aligned batch: exercises the multi-step grid + padding path.
    batch2 = 1000
    x2 = jax.random.normal(kx2, (batch2, state_dim), jnp.float32)
    out2 = jax.block_until_ready(qnet_forward(x2, params))
    ref2 = qnet_ref(x2, params)
    assert out2.shape == (batch2, action_num)
    assert jnp.allclose(out2, ref2, atol=1e-4, rtol=1e-4), "mismatch vs JAX reference (B=1000)"

    print("KERNEL_OK")
</pallas_src>

<mosaic_0001>
module attributes {stable_mosaic.version = 11 : i64} {
  func.func @_qnet_kernel(%arg0: i32, %arg1: memref<4x128xbf16, #tpu.memory_space<vmem>>, %arg2: memref<16x4xbf16, #tpu.memory_space<vmem>>, %arg3: memref<16x1xf32, #tpu.memory_space<vmem>>, %arg4: memref<16x16xf32, #tpu.memory_space<vmem>>, %arg5: memref<16x1xf32, #tpu.memory_space<vmem>>, %arg6: memref<2x16xf32, #tpu.memory_space<vmem>>, %arg7: memref<2x1xf32, #tpu.memory_space<vmem>>, %arg8: memref<2x128xf32, #tpu.memory_space<vmem>>) attributes {dimension_semantics = [#tpu.dimension_semantics<parallel>], iteration_bounds = array<i64: 1>, scalar_prefetch = 0 : i64, scratch_operands = 0 : i64, tpu.core_type = #tpu.core_type<tc>, window_params = [{transform_indices = @transform_0, window_bounds = array<i64: 4, 128>}, {pipeline_mode = #tpu.pipeline_mode<synchronous>, transform_indices = @transform_1, window_bounds = array<i64: 16, 4>}, {pipeline_mode = #tpu.pipeline_mode<synchronous>, transform_indices = @transform_2, window_bounds = array<i64: 16, 1>}, {pipeline_mode = #tpu.pipeline_mode<synchronous>, transform_indices = @transform_3, window_bounds = array<i64: 16, 16>}, {pipeline_mode = #tpu.pipeline_mode<synchronous>, transform_indices = @transform_4, window_bounds = array<i64: 16, 1>}, {pipeline_mode = #tpu.pipeline_mode<synchronous>, transform_indices = @transform_5, window_bounds = array<i64: 2, 16>}, {pipeline_mode = #tpu.pipeline_mode<synchronous>, transform_indices = @transform_6, window_bounds = array<i64: 2, 1>}, {transform_indices = @transform_7, window_bounds = array<i64: 2, 128>}]} {
    %c0 = arith.constant 0 : index
    %c0_0 = arith.constant 0 : index
    %0 = vector.load %arg1[%c0, %c0_0] : memref<4x128xbf16, #tpu.memory_space<vmem>>, vector<4x128xbf16>
    %c0_1 = arith.constant 0 : index
    %c0_2 = arith.constant 0 : index
    %1 = vector.load %arg2[%c0_1, %c0_2] : memref<16x4xbf16, #tpu.memory_space<vmem>>, vector<16x4xbf16>
    %cst = arith.constant dense<0.000000e+00> : vector<16x128xf32>
    %2 = tpu.matmul %1, %0, %cst {dimension_numbers = #tpu.dot_dimension_numbers<[1], [0], [0], [1], [0, 0, 1, 1], [], []>} : vector<16x4xbf16>, vector<4x128xbf16>, vector<16x128xf32> -> vector<16x128xf32>
    %c0_3 = arith.constant 0 : index
    %c0_4 = arith.constant 0 : index
    %3 = vector.load %arg3[%c0_3, %c0_4] : memref<16x1xf32, #tpu.memory_space<vmem>>, vector<16x1xf32>
    %4 = vector.broadcast %3 : vector<16x1xf32> to vector<16x128xf32>
    %5 = arith.addf %2, %4 : vector<16x128xf32>
    %cst_5 = arith.constant 0.000000e+00 : f32
    %6 = vector.broadcast %cst_5 : f32 to vector<16x128xf32>
    %7 = arith.maximumf %5, %6 : vector<16x128xf32>
    %c0_6 = arith.constant 0 : index
    %c0_7 = arith.constant 0 : index
    %8 = vector.load %arg4[%c0_6, %c0_7] : memref<16x16xf32, #tpu.memory_space<vmem>>, vector<16x16xf32>
    %cst_8 = arith.constant dense<0.000000e+00> : vector<16x128xf32>
    %9 = tpu.matmul %8, %7, %cst_8 {dimension_numbers = #tpu.dot_dimension_numbers<[1], [0], [0], [1], [0, 0, 1, 1], [], []>} : vector<16x16xf32>, vector<16x128xf32>, vector<16x128xf32> -> vector<16x128xf32>
    %c0_9 = arith.constant 0 : index
    %c0_10 = arith.constant 0 : index
    %10 = vector.load %arg5[%c0_9, %c0_10] : memref<16x1xf32, #tpu.memory_space<vmem>>, vector<16x1xf32>
    %11 = vector.broadcast %10 : vector<16x1xf32> to vector<16x128xf32>
    %12 = arith.addf %9, %11 : vector<16x128xf32>
    %cst_11 = arith.constant 0.000000e+00 : f32
    %13 = vector.broadcast %cst_11 : f32 to vector<16x128xf32>
    %14 = arith.maximumf %12, %13 : vector<16x128xf32>
    %c0_12 = arith.constant 0 : index
    %c0_13 = arith.constant 0 : index
    %15 = vector.load %arg6[%c0_12, %c0_13] : memref<2x16xf32, #tpu.memory_space<vmem>>, vector<2x16xf32>
    %cst_14 = arith.constant dense<0.000000e+00> : vector<2x128xf32>
    %16 = tpu.matmul %15, %14, %cst_14 {dimension_numbers = #tpu.dot_dimension_numbers<[1], [0], [0], [1], [0, 0, 1, 1], [], []>} : vector<2x16xf32>, vector<16x128xf32>, vector<2x128xf32> -> vector<2x128xf32>
    %c0_15 = arith.constant 0 : index
    %c0_16 = arith.constant 0 : index
    %17 = vector.load %arg7[%c0_15, %c0_16] : memref<2x1xf32, #tpu.memory_space<vmem>>, vector<2x1xf32>
    %18 = vector.broadcast %17 : vector<2x1xf32> to vector<2x128xf32>
    %19 = arith.addf %16, %18 : vector<2x128xf32>
    %c0_17 = arith.constant 0 : index
    %c0_18 = arith.constant 0 : index
    %20 = vector.load %arg8[%c0_17, %c0_18] : memref<2x128xf32, #tpu.memory_space<vmem>>, vector<2x128xf32>
    tpu.vector_store %arg8[%c0_17, %c0_18], %19 {strides = array<i32>} : memref<2x128xf32, #tpu.memory_space<vmem>>, vector<2x128xf32>,
    return
  }
  func.func @transform_0(%arg0: i32) -> (i32, i32) {
    %c0_i32 = arith.constant 0 : i32
    %c0_i32_0 = arith.constant 0 : i32
    return %c0_i32, %arg0 : i32, i32
  }
  func.func @transform_1(%arg0: i32) -> (i32, i32) {
    %c0_i32 = arith.constant 0 : i32
    %c0_i32_0 = arith.constant 0 : i32
    %c0_i32_1 = arith.constant 0 : i32
    return %c0_i32, %c0_i32_0 : i32, i32
  }
  func.func @transform_2(%arg0: i32) -> (i32, i32) {
    %c0_i32 = arith.constant 0 : i32
    %c0_i32_0 = arith.constant 0 : i32
    %c0_i32_1 = arith.constant 0 : i32
    return %c0_i32, %c0_i32_0 : i32, i32
  }
  func.func @transform_3(%arg0: i32) -> (i32, i32) {
    %c0_i32 = arith.constant 0 : i32
    %c0_i32_0 = arith.constant 0 : i32
    %c0_i32_1 = arith.constant 0 : i32
    return %c0_i32, %c0_i32_0 : i32, i32
  }
  func.func @transform_4(%arg0: i32) -> (i32, i32) {
    %c0_i32 = arith.constant 0 : i32
    %c0_i32_0 = arith.constant 0 : i32
    %c0_i32_1 = arith.constant 0 : i32
    return %c0_i32, %c0_i32_0 : i32, i32
  }
  func.func @transform_5(%arg0: i32) -> (i32, i32) {
    %c0_i32 = arith.constant 0 : i32
    %c0_i32_0 = arith.constant 0 : i32
    %c0_i32_1 = arith.constant 0 : i32
    return %c0_i32, %c0_i32_0 : i32, i32
  }
  func.func @transform_6(%arg0: i32) -> (i32, i32) {
    %c0_i32 = arith.constant 0 : i32
    %c0_i32_0 = arith.constant 0 : i32
    %c0_i32_1 = arith.constant 0 : i32
    return %c0_i32, %c0_i32_0 : i32, i32
  }
  func.func @transform_7(%arg0: i32) -> (i32, i32) {
    %c0_i32 = arith.constant 0 : i32
    %c0_i32_0 = arith.constant 0 : i32
    return %c0_i32, %arg0 : i32, i32
  }
}

</mosaic_0001>

<bundles_post_ra>
// kernel: qnet_forward.1
= control target key start
LH: loop header
LB: loop body
LE: loop exit
PB: predicated region body
PF: predicated region fallthrough
CT: control target
= control target key end

     0   :  { %vm51_vm0 = vcmask 1041408   ;;  %v321_v0 = vmov 0.0   ;;  %vm322_vm1 = vmmov 0   ;;  %vm47_vm2 = vcmask 31744   ;;  %s402_s0 = inlined_call_operand.vmem [shape: bf16[4,128], index: 0, kind: input, shape index: {}]   ;;  %s403_s1 = inlined_call_operand.vmem [shape: bf16[16,4], index: 1, kind: input, shape index: {}]   ;;  %s404_s2 = inlined_call_operand.vmem [shape: f32[16,1], index: 2, kind: input, shape index: {}]   ;;  %s405_s6 = inlined_call_operand.vmem [shape: f32[2,1], index: 6, kind: input, shape index: {}]   ;;  %s406_s3 = inlined_call_operand.vmem [shape: f32[16,16], index: 3, kind: input, shape index: {}]   ;;  %s407_s4 = inlined_call_operand.vmem [shape: f32[16,1], index: 4, kind: input, shape index: {}]   ;;  %s408_s5 = inlined_call_operand.vmem [shape: f32[2,16], index: 5, kind: input, shape index: {}]   ;;  %s409_s7 = inlined_call_operand.vmem [shape: f32[2,128], index: 7, kind: output, shape index: {}]  }
   0x1   :  { %295 = vmatprep.subr.bf16.mxu0 %v321_v0  ;;  %v27_v1 = vld [vmem:[%s402_s0] sm:$0x3]  ;;  %297 = vmatprep.mubr.msk.bf16.mxu0 %vm322_vm1, %v321_v0  ;;  %v31_v4 = vld [vmem:[%s404_s2 + $0x8] sm:$0xff]  ;;  %v323_v5 = vmov 0   ;;  %vm112_vm3 = vcmask 130048  }
   0x2   :  { %v53_v2 = vsel %vm51_vm0, %v27_v1, 0  ;;  %v320_v3 = vld [vmem:[%s403_s1] sm:$0xff]   ;;  %318 = vset.pattern.permute.xlu0 %v323_v5  ;;  %319 = vset.pattern.permute.xlu1 %v323_v5  ;;  %v101_v9 = vld [vmem:[%s407_s4 + $0x8] sm:$0xff] }
   0x3   :  { %296 = vmatpush3.bf16.msra.mxu0 %v53_v2  ;;  %39 = vperm.xlu0 %318, %v31_v4   ;;  %v30_v6 = vld [vmem:[%s404_s2] sm:$0xff]  ;;  %v99_v21 = vld [vmem:[%s406_s3 + $0x8] sm:$0xff] }
   0x4   :  { %v197_v7 = vld [vmem:[%s405_s6] sm:$0x3]  ;;  %109 = vperm.xlu1 %319, %v101_v9  }
   0x5   :  { %v98_v8 = vld [vmem:[%s406_s3] sm:$0xff] }
   0x6   :  { %298 = vmatmul.mubr.msk.bf16.vlgmr.msra.gmra.mxu0 %vm47_vm2, %v320_v3  ;;  %305 = vmatprep.mubr.msk.f32.mxu1 %vm112_vm3, %v98_v8  ;;  %v100_v10 = vld [vmem:[%s407_s4] sm:$0xff] }
   0x7   :  { %34 = vperm.xlu0 %318, %v30_v6   ;;  %v196_v30 = vld [vmem:[%s408_s5] sm:$0x3] }
   0x8   :  { %104 = vperm.xlu1 %319, %v100_v10  }
   0xb   :  { %200 = vperm.xlu0 %318, %v197_v7  }
  0x7e   :  { %v40_v11 = vpop.permute.xlu0 %39 }
  0x7f   :  { %v110_v22 = vpop.permute.xlu1 %109 }
  0x82   :  { %v35_v14 = vpop.permute.xlu0 %34 }
  0x83   :  { %v105_v25 = vpop.permute.xlu1 %104 }
  0x86   :  { %v201_v31 = vpop.permute.xlu0 %200 }
  0xc6   :  { %v89_v12 = vpop.f32.mrf.mxu0 }
  0xc7   :  { %v90_v16 = vadd.f32 %v89_v12, %v35_v14 }
  0xc8   :  { %v299_v13 = vpop.f32.mrf.mxu0 }
  0xc9   :  { %v96_v20 = vmax.f32 %v90_v16, 0.0 }
  0xca   :  { %v92_v15 = vpop.f32.mrf.mxu0 }
  0xcb   :  { %v93_v17 = vadd.f32 %v92_v15, %v40_v11 }
  0xcc   :  { %v300_v18 = vpop.f32.mrf.mxu0 }
  0xcd   :  { %v97_v19 = vmax.f32 %v93_v17, 0.0 }
  0xcf   :  { %301 = vmatprep.subr.mxu1 %v97_v19 }
  0xd0   :  { %302 = vmatpush3.msra.mxu1 %v97_v19 }
  0xd1   :  { %303 = vmatprep.subr.mxu1 %v96_v20 }
  0xd2   :  { %304 = vmatpush3.msra.mxu1 %v96_v20 }
  0xd3   :  { %306 = vmatmul.mubr.msk.f32.vlgmr.msra.gmra.mxu1 %vm112_vm3, %v99_v21  ;;  %308 = vmatprep.subr.mxu1 %v321_v0 }
  0xd4   :  { %312 = vmatprep.mubr.msk.f32.mxu1 %vm322_vm1, %v321_v0 }
 0x193   :  { %v307_v23 = vpop.f32.mrf.mxu1 }
 0x194   :  { %v191_v24 = vadd.f32 %v307_v23, %v110_v22 }
 0x195   :  { %v185_v26 = vpop.f32.mrf.mxu1 }
 0x196   :  { %v195_v27 = vmax.f32 %v191_v24, 0.0  ;;  %v186_v28 = vadd.f32 %v185_v26, %v105_v25 }
 0x198   :  { %v194_v29 = vmax.f32 %v186_v28, 0.0  ;;  %309 = vmatpush3.msra.mxu1 %v195_v27 }
 0x199   :  { %310 = vmatprep.subr.mxu1 %v321_v0 }
 0x19a   :  { %311 = vmatpush3.msra.mxu1 %v194_v29 }
 0x19b   :  { %313 = vmatmul.mubr.msk.f32.vlgmr.msra.gmra.mxu1 %vm112_vm3, %v196_v30 }
 0x25b   :  { %v272_v32 = vpop.f32.mrf.mxu1 }
 0x25c   :  { %v273_v33 = vadd.f32 %v272_v32, %v201_v31 }
 0x25d   :  { %v314_v34 = vpop.f32.mrf.mxu1 }
 0x25e   :  { %276 = vst [vmem:[%s409_s7] sm:$0x3] %v273_v33 }

</bundles_post_ra>
